<compile_context>
chip_gen: v6e
topology: v6e:2x2x1
jax: 0.10.0
libtpu: 0.0.40
codegen_flags: <defaults>
</compile_context>

<pallas_src>
import jax
import jax.numpy as jnp
from jax.experimental import pallas as pl
from jax.experimental.pallas import tpu as pltpu


def _round_up(x, m):
    return (x + m - 1) // m * m


# ----------------------------- Pallas kernel -------------------------------

def vit_embed_kernel(patches_ref, w_ref, add_ref, out_ref):
    # patches_ref: (Bblk, M_pad, CKK_pad) bf16  (row 0 of each batch = zeros -> cls slot)
    # w_ref:       (CKK_pad, D)           bf16  (zero rows in the padded tail)
    # add_ref:     (M_pad, D)             f32   (row 0 = cls+pos0, rows 1..N = bias+pos)
    # out_ref:     (Bblk, N+1, D)
    bblk, m_pad, ckk = patches_ref.shape
    n_out = out_ref.shape[1]

    x = patches_ref[...].reshape(bblk * m_pad, ckk)                    # aligned collapse
    emb = jnp.dot(x, w_ref[...], preferred_element_type=jnp.float32)   # bf16 MXU, f32 acc
    emb = emb.reshape(bblk, m_pad, -1) + add_ref[...]                  # f32 cls/bias/pos add
    out_ref[...] = emb[:, :n_out, :].astype(out_ref.dtype)             # single store


# ------------------------------- glue / setup ------------------------------

def sinusoidal_pos_encoding(seq_len, d_model):
    """Standard sinusoidal PE, channels_last: pe[p, 2i]=sin, pe[p, 2i+1]=cos."""
    pos = jnp.arange(seq_len, dtype=jnp.float32)[:, None]
    div = jnp.exp(jnp.arange(0, d_model, 2, dtype=jnp.float32)
                  * (-jnp.log(10000.0) / d_model))
    ang = pos * div
    pe = jnp.zeros((seq_len, d_model), dtype=jnp.float32)
    pe = pe.at[:, 0::2].set(jnp.sin(ang))
    pe = pe.at[:, 1::2].set(jnp.cos(ang)[:, : d_model // 2])   # handles odd d_model
    return pe


def _choose_batch_block(batch, m_pad, rows_target=256):
    """Largest batch block whose rows fit ~one MXU-sized tile, keeping >=2 grid steps."""
    cands = [c for c in range(1, batch + 1)
             if batch % c == 0 and c * m_pad <= rows_target]
    if not cands:
        return 1
    multi = [c for c in cands if batch // c >= 2]   # keep both v7x TensorCores busy
    return max(multi) if multi else max(cands)


def vit_embeddings_pallas(x, conv_weight, conv_bias, cls_token, patch_size,
                          hidden_dropout_prob=0.0, batch_block=None,
                          out_dtype=jnp.float32):
    """Forward of ViTEmbeddings.  x: (B, 3, H, W) NCHW float32."""
    B, C, H, W = x.shape
    D, Cw, K, _ = conv_weight.shape
    assert Cw == C
    stride = patch_size
    pad = (K - 1) // 2                        # ConvLayer's auto padding (K odd)
    H_out = (H + 2 * pad - K) // stride + 1
    W_out = (W + 2 * pad - K) // stride + 1
    N = H_out * W_out
    CKK = C * K * K

    m_pad = _round_up(N + 1, 16)              # cls slot + N patch rows, bf16-sublane aligned
    ckk_pad = _round_up(CKK, 128)             # lane-dense contraction dim

    # im2col, feature-last (no HBM transpose).  Feature order is (channel, kh, kw),
    # matching PyTorch Conv2d weight.reshape(D, C*K*K) -- validated against the
    # conv-based reference in __main__.
    patches = jax.lax.conv_general_dilated_patches(
        x, (K, K), (stride, stride), ((pad, pad), (pad, pad)),
        dimension_numbers=('NCHW', 'OIHW', 'NHWC'))              # (B, Ho, Wo, CKK)
    patches = patches.reshape(B, N, CKK).astype(jnp.bfloat16)

    # One fused pad: leading zero row per batch (cls slot) + sublane/lane padding.
    patches_pad = jnp.pad(
        patches, ((0, 0), (1, m_pad - (N + 1)), (0, ckk_pad - CKK)))

    w_flat = conv_weight.reshape(D, CKK).T.astype(jnp.bfloat16)   # (CKK, D)
    w_pad = jnp.pad(w_flat, ((0, ckk_pad - CKK), (0, 0)))

    pos = sinusoidal_pos_encoding(N + 1, D)                       # (N+1, D) f32
    add_table = jnp.zeros((m_pad, D), jnp.float32)
    add_table = add_table.at[0].set(cls_token.reshape(D).astype(jnp.float32) + pos[0])
    add_table = add_table.at[1:N + 1].set(
        conv_bias.reshape(1, D).astype(jnp.float32) + pos[1:])

    if batch_block is None:
        batch_block = _choose_batch_block(B, m_pad)
    assert B % batch_block == 0
    grid = (B // batch_block,)

    # VMEM budget estimate (double-buffered blocks + headroom); relevant on v7x (64 MiB).
    blk_bytes = (batch_block * m_pad * ckk_pad * 2 + ckk_pad * D * 2
                 + m_pad * D * 4 + batch_block * (N + 1) * D * 4)
    vmem_limit = int(min(max(4 * blk_bytes, 16 * 2 ** 20), 48 * 2 ** 20))

    out = pl.pallas_call(
        vit_embed_kernel,
        out_shape=jax.ShapeDtypeStruct((B, N + 1, D), out_dtype),
        grid_spec=pltpu.PrefetchScalarGridSpec(
            num_scalar_prefetch=0,
            grid=grid,
            in_specs=[
                pl.BlockSpec((batch_block, m_pad, ckk_pad), lambda b: (b, 0, 0)),
                pl.BlockSpec((ckk_pad, D), lambda b: (0, 0)),
                pl.BlockSpec((m_pad, D), lambda b: (0, 0)),
            ],
            out_specs=pl.BlockSpec((batch_block, N + 1, D), lambda b: (b, 0, 0)),
        ),
        compiler_params=pltpu.CompilerParams(
            dimension_semantics=("parallel",),
            vmem_limit_bytes=vmem_limit),
    )(patches_pad, w_pad, add_table)

    # nn.Dropout at inference is the identity.
    # TODO(synk): training-mode dropout (p=hidden_dropout_prob) not implemented.
    return out


# ------------------------------ reference (JAX) ----------------------------

def vit_embeddings_ref(x, conv_weight, conv_bias, cls_token, patch_size):
    B, C, H, W = x.shape
    D, _, K, _ = conv_weight.shape
    stride = patch_size
    pad = (K - 1) // 2
    dn = jax.lax.conv_dimension_numbers(x.shape, conv_weight.shape,
                                        ('NCHW', 'OIHW', 'NCHW'))
    conv = jax.lax.conv_general_dilated(
        x, conv_weight, (stride, stride), ((pad, pad), (pad, pad)),
        dimension_numbers=dn) + conv_bias.reshape(1, D, 1, 1)
    B_, D_, Ho, Wo = conv.shape
    N = Ho * Wo
    seq = conv.reshape(B, D, N).transpose(0, 2, 1)                   # (B, N, D)
    cls = jnp.broadcast_to(cls_token.reshape(1, 1, D), (B, 1, D))
    seq = jnp.concatenate([cls, seq], axis=1)                        # (B, N+1, D)
    pos = sinusoidal_pos_encoding(N + 1, D)
    return seq + pos[None]


# ---------------------------------- main -----------------------------------

if __name__ == "__main__":
    # Small shapes consistent with the module: module forces image_channels=3.
    B, C, H, W = 2, 3, 16, 16
    patch_size = 4
    hidden_size = 32
    hidden_dropout_prob = 0.0

    # kernel_size = patch_size (+1 if even), as in __init__
    K = patch_size + 1 if patch_size % 2 == 0 else patch_size

    key = jax.random.PRNGKey(0)
    kx, kw, kb, kc = jax.random.split(key, 4)

    x = jax.random.normal(kx, (B, C, H, W), dtype=jnp.float32)

    # Deterministic parameter init (shapes follow nn.Conv2d / cls_token in __init__).
    fan_in = C * K * K
    bound = 1.0 / jnp.sqrt(fan_in)
    conv_weight = jax.random.uniform(kw, (hidden_size, C, K, K),
                                     minval=-bound, maxval=bound, dtype=jnp.float32)
    conv_bias = jax.random.uniform(kb, (hidden_size,),
                                   minval=-bound, maxval=bound, dtype=jnp.float32)
    cls_token = 0.02 * jax.random.normal(kc, (1, 1, hidden_size), dtype=jnp.float32)

    out = vit_embeddings_pallas(x, conv_weight, conv_bias, cls_token,
                                patch_size, hidden_dropout_prob)
    out = jax.block_until_ready(out)

    ref = vit_embeddings_ref(x, conv_weight, conv_bias, cls_token, patch_size)
    assert out.shape == ref.shape == (B, (H // patch_size) * (W // patch_size) + 1,
                                      hidden_size)
    max_err = float(jnp.max(jnp.abs(out - ref)))
    # bf16 MXU operands (f32 accumulation) vs an all-f32 reference -> loose tolerance.
    assert jnp.allclose(out, ref, rtol=3e-2, atol=3e-2), f"max err {max_err}"

    print("KERNEL_OK")
</pallas_src>

<mosaic_0001>
module attributes {stable_mosaic.version = 11 : i64} {
  func.func @vit_embed_kernel(%arg0: i32, %arg1: memref<1x32x128xbf16, #tpu.memory_space<vmem>>, %arg2: memref<128x32xbf16, #tpu.memory_space<vmem>>, %arg3: memref<32x32xf32, #tpu.memory_space<vmem>>, %arg4: memref<1x17x32xf32, #tpu.memory_space<vmem>>) attributes {dimension_semantics = [#tpu.dimension_semantics<parallel>], iteration_bounds = array<i64: 2>, scalar_prefetch = 0 : i64, scratch_operands = 0 : i64, tpu.core_type = #tpu.core_type<tc>, window_params = [{transform_indices = @transform_0, window_bounds = array<i64: 1, 32, 128>}, {pipeline_mode = #tpu.pipeline_mode<synchronous>, transform_indices = @transform_1, window_bounds = array<i64: 128, 32>}, {pipeline_mode = #tpu.pipeline_mode<synchronous>, transform_indices = @transform_2, window_bounds = array<i64: 32, 32>}, {transform_indices = @transform_3, window_bounds = array<i64: 1, 17, 32>}]} {
    %c0 = arith.constant 0 : index
    %c0_0 = arith.constant 0 : index
    %c0_1 = arith.constant 0 : index
    %0 = vector.load %arg1[%c0, %c0_0, %c0_1] : memref<1x32x128xbf16, #tpu.memory_space<vmem>>, vector<1x32x128xbf16>
    %1 = vector.shape_cast %0 : vector<1x32x128xbf16> to vector<32x128xbf16>
    %c0_2 = arith.constant 0 : index
    %c0_3 = arith.constant 0 : index
    %2 = vector.load %arg2[%c0_2, %c0_3] : memref<128x32xbf16, #tpu.memory_space<vmem>>, vector<128x32xbf16>
    %cst = arith.constant dense<0.000000e+00> : vector<32x32xf32>
    %3 = tpu.matmul %1, %2, %cst {dimension_numbers = #tpu.dot_dimension_numbers<[1], [0], [0], [1], [0, 0, 1, 1], [], []>} : vector<32x128xbf16>, vector<128x32xbf16>, vector<32x32xf32> -> vector<32x32xf32>
    %4 = vector.shape_cast %3 : vector<32x32xf32> to vector<1x32x32xf32>
    %c0_4 = arith.constant 0 : index
    %c0_5 = arith.constant 0 : index
    %5 = vector.load %arg3[%c0_4, %c0_5] : memref<32x32xf32, #tpu.memory_space<vmem>>, vector<32x32xf32>
    %6 = vector.shape_cast %5 : vector<32x32xf32> to vector<1x32x32xf32>
    %7 = arith.addf %4, %6 : vector<1x32x32xf32>
    %8 = vector.extract_strided_slice %7 {offsets = [0, 0, 0], sizes = [1, 17, 32], strides = [1, 1, 1]} : vector<1x32x32xf32> to vector<1x17x32xf32>
    %c0_6 = arith.constant 0 : index
    %c0_7 = arith.constant 0 : index
    %c0_8 = arith.constant 0 : index
    %9 = vector.load %arg4[%c0_6, %c0_7, %c0_8] : memref<1x17x32xf32, #tpu.memory_space<vmem>>, vector<1x17x32xf32>
    tpu.vector_store %arg4[%c0_6, %c0_7, %c0_8], %8 {strides = array<i32>} : memref<1x17x32xf32, #tpu.memory_space<vmem>>, vector<1x17x32xf32>,
    return
  }
  func.func @transform_0(%arg0: i32) -> (i32, i32, i32) {
    %c0_i32 = arith.constant 0 : i32
    %c0_i32_0 = arith.constant 0 : i32
    %c0_i32_1 = arith.constant 0 : i32
    return %arg0, %c0_i32, %c0_i32_0 : i32, i32, i32
  }
  func.func @transform_1(%arg0: i32) -> (i32, i32) {
    %c0_i32 = arith.constant 0 : i32
    %c0_i32_0 = arith.constant 0 : i32
    %c0_i32_1 = arith.constant 0 : i32
    return %c0_i32, %c0_i32_0 : i32, i32
  }
  func.func @transform_2(%arg0: i32) -> (i32, i32) {
    %c0_i32 = arith.constant 0 : i32
    %c0_i32_0 = arith.constant 0 : i32
    %c0_i32_1 = arith.constant 0 : i32
    return %c0_i32, %c0_i32_0 : i32, i32
  }
  func.func @transform_3(%arg0: i32) -> (i32, i32, i32) {
    %c0_i32 = arith.constant 0 : i32
    %c0_i32_0 = arith.constant 0 : i32
    %c0_i32_1 = arith.constant 0 : i32
    return %arg0, %c0_i32, %c0_i32_0 : i32, i32, i32
  }
}

</mosaic_0001>

<bundles_post_ra>
// kernel: tpu_custom_call.1
= control target key start
LH: loop header
LB: loop body
LE: loop exit
PB: predicated region body
PF: predicated region fallthrough
CT: control target
= control target key end

     0   :  { %s464_s12 = smov 0   ;;  %s518_s0 = inlined_call_operand.vmem [shape: bf16[2,32,128], index: 0, kind: input, shape index: {}]   ;;  %s519_s1 = inlined_call_operand.vmem [shape: bf16[128,32], index: 1, kind: input, shape index: {}]   ;;  %s520_s2 = inlined_call_operand.vmem [shape: f32[32,32], index: 2, kind: input, shape index: {}]   ;;  %s521_s3 = inlined_call_operand.vmem [shape: f32[2,17,32], index: 3, kind: output, shape index: {}]  }
   0x1 LB: > { %s366_s13 = sadd.s32 4294967295, %s442_s12   ;;  %p370_p0 = scmp.ge.s32.totalorder %s442_s12, 1  ;;  %s442_s12 = sphi %s464_s12, %s13_s12  }
   0x2   : > { %p137_p1 = scmp.lt.s32.totalorder %s442_s12, 3 }
   0x4   : > { %p138_p2 = pnand %p370_p0, %p137_p1 }
   0x5   : > { %p161_p3 = scmp.lt.s32.totalorder (!%p138_p2), %s366_s13, 1 }
   0x6   : > { %141 = sbr.rel (%p138_p2) target bundleno = 246 (0xf6), region = 32 }
   0xb   : > { %v426_v0 = vld [vmem:[%s519_s1 + $0x38] sm:$0xff]   ;;  %v427_v1 = vld [vmem:[%s519_s1 + $0x30] sm:$0xff]   ;;  %s523_s13 = smov (!%p161_p3, %s366_s13), 1  ;;  %v428_v2 = vld [vmem:[%s519_s1 + $0x28] sm:$0xff]   ;;  %vm309_vm0 = vcmask 253952   ;;  %vm306_vm1 = vcmask 261120  }
   0xc   : > { %397 = vmatprep.subr.bf16.mxu0 %v426_v0  ;;  %s386_s20 = sshll.u32 %s523_s13, 4  ;;  %v429_v3 = vld [vmem:[%s519_s1 + $0x20] sm:$0xff]   ;;  %v430_v5 = vld [vmem:[%s519_s1 + $0x18] sm:$0xff]   ;;  %v431_v6 = vld [vmem:[%s519_s1 + $0x10] sm:$0xff]   ;;  %s417_s7 = smul.u32 24, %s523_s13 }
   0xd   : > { %398 = vmatpush3.bf16.msra.mxu0 %v426_v0  ;;  %s165_s23 = scalar_lea.vmem %s518_s0, %s386_s20  ;;  %v432_v7 = vld [vmem:[%s519_s1 + $0x8] sm:$0xff]   ;;  %v433_v8 = vld [vmem:[%s519_s1] sm:$0xff]   ;;  %v302_v10 = vld [vmem:[%s520_s2 + $0x10] sm:$0xff] }
   0xe   : > { %399 = vmatprep.subr.bf16.mxu0 %v427_v1  ;;  %v434_v4 = vld [vmem:[%s165_s23] sm:$0xff]   ;;  %v435_v9 = vld [vmem:[%s165_s23 + $0x8] sm:$0xff]   ;;  %s170_s14 = scalar_lea.vmem %s521_s3, %s417_s7 }
   0xf   : > { %413 = vmatprep.mubr.bf16.mxu0 %v434_v4  ;;  %v300_v12 = vld [vmem:[%s520_s2] sm:$0xff]  ;;  %v301_v17 = vld [vmem:[%s520_s2 + $0x8] sm:$0xff] }
  0x11   : > { %400 = vmatpush3.bf16.msra.mxu0 %v427_v1 }
  0x12   : > { %401 = vmatprep.subr.bf16.mxu0 %v428_v2 }
  0x15   : > { %402 = vmatpush3.bf16.msra.mxu0 %v428_v2 }
  0x16   : > { %403 = vmatprep.subr.bf16.mxu0 %v429_v3 }
  0x19   : > { %404 = vmatpush3.bf16.msra.mxu0 %v429_v3 }
  0x1a   : > { %405 = vmatprep.subr.bf16.mxu0 %v430_v5 }
  0x1d   : > { %406 = vmatpush3.bf16.msra.mxu0 %v430_v5 }
  0x1e   : > { %407 = vmatprep.subr.bf16.mxu0 %v431_v6 }
  0x21   : > { %408 = vmatpush3.bf16.msra.mxu0 %v431_v6 }
  0x22   : > { %409 = vmatprep.subr.bf16.mxu0 %v432_v7 }
  0x25   : > { %410 = vmatpush3.bf16.msra.mxu0 %v432_v7 }
  0x26   : > { %411 = vmatprep.subr.bf16.mxu0 %v433_v8 }
  0x29   : > { %412 = vmatpush3.bf16.msra.mxu0 %v433_v8 }
  0x2c   : > { %414 = vmatmul.mubr.bf16.vlgmr.msra.gmra.mxu0 %v435_v9 }
  0xec   : > { %v415_v11 = vpop.f32.mrf.mxu0 }
  0xed   : > { %v305_v13 = vadd.f32 %v415_v11, %v302_v10 }
  0xee   : > { %v286_v14 = vpop.f32.mrf.mxu0 }
  0xef   : > { %310 = vst.msk [vmem:[%s170_s14 + $0x10] sm:$0x1] %vm309_vm0, %v305_v13  ;;  %v303_v15 = vadd.f32 %v300_v12, %v286_v14 }
  0xf0   : > { %v416_v16 = vpop.f32.mrf.mxu0 }
  0xf1   : > { %307 = vst.msk [vmem:[%s170_s14] sm:$0xff] %vm306_vm1, %v303_v15 }
  0xf2   : > { %v289_v18 = vpop.f32.mrf.mxu0 }
  0xf3   : > { %v304_v19 = vadd.f32 %v301_v17, %v289_v18 }
  0xf5   : > { %308 = vst.msk [vmem:[%s170_s14 + $0x8] sm:$0xff] %vm306_vm1, %v304_v19 }
  0xf6 PF: > { %s13_s12 = sadd.s32 1, %s442_s12  }
  0xf7   : > { %p10_p4 = scmp.ge.s32.totalorder %s13_s12, 4  }
  0xf9   :  { %12 = sbr.rel (!%p10_p4) target bundleno = 1 (0x1), region = 62 }

</bundles_post_ra>
